<compile_context>
chip_gen: v6e
topology: v6e:2x2x1
jax: 0.10.0
libtpu: 0.0.40
codegen_flags: <defaults>
</compile_context>

<pallas_src>
import jax
import jax.numpy as jnp
from jax.experimental import pallas as pl
from jax.experimental.pallas import tpu as pltpu


def _layernorm(x, gamma, beta, eps=1e-5):
    # One-pass statistics: E[x], E[x^2] (halves the cross-lane reductions).
    m = jnp.mean(x, axis=-1, keepdims=True)
    m2 = jnp.mean(x * x, axis=-1, keepdims=True)
    var = m2 - m * m
    return (x - m) * jax.lax.rsqrt(var + eps) * gamma + beta


def _gelu(x, exact):
    if exact:
        # PyTorch nn.GELU() default: exact erf-based GELU (kept exact for parity).
        return 0.5 * x * (1.0 + jax.lax.erf(x * 0.7071067811865476))
    # Tanh approximation runs on the EUP (separate VLIW slot) -- use when the VALU
    # is the saturating unit in the MLP phase and exact parity is not required.
    return jax.nn.gelu(x, approximate=True)


def _make_block_kernel(num_heads, n_real, has_qkv_bias, exact_gelu):
    def kernel(x_ref, ln1_g_ref, ln1_b_ref, wqkv_ref, *args):
        args = list(args)
        if has_qkv_bias:
            bqkv_ref = args.pop(0)
        (wproj_ref, bproj_ref, ln2_g_ref, ln2_b_ref,
         wfc1_ref, bfc1_ref, wfc2_ref, bfc2_ref, out_ref) = args

        x = x_ref[0]                                   # (Np, D) fp32 residual stream
        npad, d = x.shape
        hd = d // num_heads

        # ---- Attention branch ------------------------------------------------
        xn = _layernorm(x, ln1_g_ref[...], ln1_b_ref[...])           # fp32 (Np, D)

        # Fused, lane-dense QKV projection: one (Np,D)@(D,3D) bf16 matmul, fp32 acc.
        qkv = jnp.dot(xn.astype(jnp.bfloat16), wqkv_ref[...],
                      preferred_element_type=jnp.float32)            # (Np, 3D)
        if has_qkv_bias:
            qkv = qkv + bqkv_ref[...]

        # Split heads only for the score / PV einsums.
        def split_heads(t):                                          # (Np, D) -> (H, Np, hd)
            return jnp.transpose(t.reshape(npad, num_heads, hd), (1, 0, 2))

        q = split_heads(qkv[:, :d])                                  # qk scale already folded in
        k = split_heads(qkv[:, d:2 * d])
        v = split_heads(qkv[:, 2 * d:])

        # TODO(synk): for N >~ 512 tile queries with an online softmax (flash-style
        # second grid axis) instead of materializing the full (H,N,N) fp32 scores.
        att = jnp.einsum('hnd,hmd->hnm',
                         q.astype(jnp.bfloat16), k.astype(jnp.bfloat16),
                         preferred_element_type=jnp.float32)         # (H, Np, Np) fp32
        if n_real < npad:
            key_valid = jax.lax.broadcasted_iota(jnp.int32, (1, 1, npad), 2) < n_real
            att = jnp.where(key_valid, att, -1e30)
        att = att - jnp.max(att, axis=-1, keepdims=True)
        p = jnp.exp(att)
        l = jnp.sum(p, axis=-1, keepdims=True)                       # (H, Np, 1)

        o = jnp.einsum('hnm,hmd->hnd',
                       p.astype(jnp.bfloat16), v.astype(jnp.bfloat16),
                       preferred_element_type=jnp.float32)           # (H, Np, hd)
        # Row-scalar softmax normalization commutes through the PV matmul:
        # scale the small (H,Np,hd) output instead of the (H,Np,Np) probabilities.
        o = o * pl.reciprocal(l, approx=True)

        # Head-major concat (matches torch transpose(1,2).reshape), then ONE
        # full-width (Np,D)@(D,D) output projection.
        o = jnp.transpose(o, (1, 0, 2)).reshape(npad, d)
        attn_out = jnp.dot(o.astype(jnp.bfloat16), wproj_ref[...],
                           preferred_element_type=jnp.float32) + bproj_ref[...]

        x = x + attn_out                                             # residual 1 (fp32)

        # ---- MLP branch --------------------------------------------------------
        xn2 = _layernorm(x, ln2_g_ref[...], ln2_b_ref[...])          # fp32 (Np, D)
        h1 = jnp.dot(xn2.astype(jnp.bfloat16), wfc1_ref[...],
                     preferred_element_type=jnp.float32) + bfc1_ref[...]
        h1 = _gelu(h1, exact_gelu)
        h2 = jnp.dot(h1.astype(jnp.bfloat16), wfc2_ref[...],
                     preferred_element_type=jnp.float32) + bfc2_ref[...]

        out_ref[0] = (x + h2).astype(out_ref.dtype)                  # residual 2

    return kernel


def vit_block(x, params, num_heads, qkv_bias=False, exact_gelu=True):
    B, N, D = x.shape
    hd = D // num_heads
    scale = hd ** -0.5

    # Pad seq len to a sublane multiple (8); padded keys are masked in-kernel and
    # padded query rows are sliced off afterwards.
    Np = ((N + 7) // 8) * 8
    x_in = jnp.pad(x, ((0, 0), (0, Np - N), (0, 0))) if Np != N else x

    # Fold 1/sqrt(head_dim) into the Q slice of the fused QKV weight (+ bias).
    # Matmul weights cast to bf16 (MXU-native); biases / LN params stay fp32
    # (added after fp32 MXU accumulation).
    wqkv = params["wqkv"]
    wqkv_s = jnp.concatenate([wqkv[:, :D] * scale, wqkv[:, D:]], axis=1).astype(jnp.bfloat16)

    plist = [params["ln1_g"], params["ln1_b"], wqkv_s]
    if qkv_bias:
        bqkv = params["bqkv"]
        plist.append(jnp.concatenate([bqkv[:, :D] * scale, bqkv[:, D:]], axis=1))
    plist += [
        params["wproj"].astype(jnp.bfloat16), params["bproj"],
        params["ln2_g"], params["ln2_b"],
        params["wfc1"].astype(jnp.bfloat16), params["bfc1"],
        params["wfc2"].astype(jnp.bfloat16), params["bfc2"],
    ]

    # Constant index_map -> same weight block every grid step: single-buffer it so the
    # weight set is not duplicated in VMEM (essential headroom on v7x's 64 MiB VMEM).
    def weight_spec(a):
        nd = a.ndim
        return pl.BlockSpec(a.shape, lambda b, _nd=nd: (0,) * _nd,
                            pipeline_mode=pl.Buffered(1))

    in_specs = [pl.BlockSpec((1, Np, D), lambda b: (b, 0, 0))] + [weight_spec(p) for p in plist]
    out_spec = pl.BlockSpec((1, Np, D), lambda b: (b, 0, 0))

    kernel = _make_block_kernel(num_heads, N, qkv_bias, exact_gelu)

    out = pl.pallas_call(
        kernel,
        out_shape=jax.ShapeDtypeStruct((B, Np, D), x.dtype),
        grid_spec=pltpu.PrefetchScalarGridSpec(
            num_scalar_prefetch=0,
            grid=(B,),
            in_specs=in_specs,
            out_specs=out_spec,
        ),
        compiler_params=pltpu.CompilerParams(
            # TODO(synk): use pltpu.CORE_PARALLEL (or add a query-tile grid axis when
            # B==1) to actually engage both v7x TensorCores; plain "parallel" is a
            # cheap no-op on v5e/v6e.
            dimension_semantics=("parallel",),
            # 48 MiB: headroom under v7x's 64 MiB per-TC physical VMEM; above the
            # default scoped limit on v5e/v6e. Irrelevant at the small demo shapes.
            vmem_limit_bytes=48 * 1024 * 1024,
        ),
    )(x_in, *plist)

    return out[:, :N, :] if Np != N else out


def init_params(key, dim, num_heads, mlp_ratio=4, qkv_bias=False):
    hidden = int(dim * mlp_ratio)
    ks = jax.random.split(key, 8)
    s = 0.02
    params = {
        "ln1_g": jnp.ones((1, dim), jnp.float32),
        "ln1_b": jnp.zeros((1, dim), jnp.float32),
        "wqkv": s * jax.random.normal(ks[0], (dim, 3 * dim), jnp.float32),
        "bqkv": (s * jax.random.normal(ks[1], (1, 3 * dim), jnp.float32)
                 if qkv_bias else jnp.zeros((1, 3 * dim), jnp.float32)),
        "wproj": s * jax.random.normal(ks[2], (dim, dim), jnp.float32),
        "bproj": s * jax.random.normal(ks[3], (1, dim), jnp.float32),
        "ln2_g": jnp.ones((1, dim), jnp.float32),
        "ln2_b": jnp.zeros((1, dim), jnp.float32),
        "wfc1": s * jax.random.normal(ks[4], (dim, hidden), jnp.float32),
        "bfc1": s * jax.random.normal(ks[5], (1, hidden), jnp.float32),
        "wfc2": s * jax.random.normal(ks[6], (hidden, dim), jnp.float32),
        "bfc2": s * jax.random.normal(ks[7], (1, dim), jnp.float32),
    }
    return params


def reference_block(x, p, num_heads):
    """Pure-JAX fp32 reference matching the PyTorch forward semantics."""
    B, N, D = x.shape
    hd = D // num_heads
    scale = hd ** -0.5

    def ln(v, g, b):
        mu = jnp.mean(v, axis=-1, keepdims=True)
        var = jnp.mean((v - mu) ** 2, axis=-1, keepdims=True)
        return (v - mu) / jnp.sqrt(var + 1e-5) * g + b

    xn = ln(x, p["ln1_g"], p["ln1_b"])
    qkv = xn @ p["wqkv"] + p["bqkv"]                       # (B, N, 3D)
    qkv = qkv.reshape(B, N, 3, num_heads, hd).transpose(2, 0, 3, 1, 4)
    q, k, v = qkv[0], qkv[1], qkv[2]                       # (B, H, N, hd)
    att = jnp.einsum("bhnd,bhmd->bhnm", q, k) * scale
    att = jax.nn.softmax(att, axis=-1)
    o = jnp.einsum("bhnm,bhmd->bhnd", att, v).transpose(0, 2, 1, 3).reshape(B, N, D)
    o = o @ p["wproj"] + p["bproj"]
    x = x + o
    xn2 = ln(x, p["ln2_g"], p["ln2_b"])
    h = jax.nn.gelu(xn2 @ p["wfc1"] + p["bfc1"], approximate=False)
    h = h @ p["wfc2"] + p["bfc2"]
    return x + h


if __name__ == "__main__":
    B, N, D, H = 2, 8, 32, 4
    key = jax.random.PRNGKey(0)
    kx, kp = jax.random.split(key)

    x = jax.random.normal(kx, (B, N, D), jnp.float32)
    params = init_params(kp, D, H, mlp_ratio=4, qkv_bias=False)

    out = jax.block_until_ready(vit_block(x, params, num_heads=H, qkv_bias=False))
    ref = reference_block(x, params, H)

    assert out.shape == (B, N, D)
    assert jnp.all(jnp.isfinite(out))
    # bf16 matmul operands + approximate reciprocal -> looser tolerance than pure fp32.
    assert jnp.allclose(out, ref, rtol=2e-2, atol=2e-2)

    print("KERNEL_OK")
</pallas_src>

<mosaic_0001>
module attributes {stable_mosaic.version = 11 : i64} {
  func.func @kernel(%arg0: i32, %arg1: memref<1x8x32xf32, #tpu.memory_space<vmem>>, %arg2: memref<1x32xf32, #tpu.memory_space<vmem>>, %arg3: memref<1x32xf32, #tpu.memory_space<vmem>>, %arg4: memref<32x96xbf16, #tpu.memory_space<vmem>>, %arg5: memref<32x32xbf16, #tpu.memory_space<vmem>>, %arg6: memref<1x32xf32, #tpu.memory_space<vmem>>, %arg7: memref<1x32xf32, #tpu.memory_space<vmem>>, %arg8: memref<1x32xf32, #tpu.memory_space<vmem>>, %arg9: memref<32x128xbf16, #tpu.memory_space<vmem>>, %arg10: memref<1x128xf32, #tpu.memory_space<vmem>>, %arg11: memref<128x32xbf16, #tpu.memory_space<vmem>>, %arg12: memref<1x32xf32, #tpu.memory_space<vmem>>, %arg13: memref<1x8x32xf32, #tpu.memory_space<vmem>>) attributes {dimension_semantics = [#tpu.dimension_semantics<parallel>], iteration_bounds = array<i64: 2>, scalar_prefetch = 0 : i64, scratch_operands = 0 : i64, tpu.core_type = #tpu.core_type<tc>, window_params = [{transform_indices = @transform_0, window_bounds = array<i64: 1, 8, 32>}, {pipeline_mode = #tpu.pipeline_mode<synchronous>, transform_indices = @transform_1, window_bounds = array<i64: 1, 32>}, {pipeline_mode = #tpu.pipeline_mode<synchronous>, transform_indices = @transform_2, window_bounds = array<i64: 1, 32>}, {pipeline_mode = #tpu.pipeline_mode<synchronous>, transform_indices = @transform_3, window_bounds = array<i64: 32, 96>}, {pipeline_mode = #tpu.pipeline_mode<synchronous>, transform_indices = @transform_4, window_bounds = array<i64: 32, 32>}, {pipeline_mode = #tpu.pipeline_mode<synchronous>, transform_indices = @transform_5, window_bounds = array<i64: 1, 32>}, {pipeline_mode = #tpu.pipeline_mode<synchronous>, transform_indices = @transform_6, window_bounds = array<i64: 1, 32>}, {pipeline_mode = #tpu.pipeline_mode<synchronous>, transform_indices = @transform_7, window_bounds = array<i64: 1, 32>}, {pipeline_mode = #tpu.pipeline_mode<synchronous>, transform_indices = @transform_8, window_bounds = array<i64: 32, 128>}, {pipeline_mode = #tpu.pipeline_mode<synchronous>, transform_indices = @transform_9, window_bounds = array<i64: 1, 128>}, {pipeline_mode = #tpu.pipeline_mode<synchronous>, transform_indices = @transform_10, window_bounds = array<i64: 128, 32>}, {pipeline_mode = #tpu.pipeline_mode<synchronous>, transform_indices = @transform_11, window_bounds = array<i64: 1, 32>}, {transform_indices = @transform_12, window_bounds = array<i64: 1, 8, 32>}]} {
    %c0 = arith.constant 0 : index
    %c0_0 = arith.constant 0 : index
    %c0_1 = arith.constant 0 : index
    %0 = vector.load %arg1[%c0, %c0_0, %c0_1] : memref<1x8x32xf32, #tpu.memory_space<vmem>>, vector<1x8x32xf32>
    %1 = vector.shape_cast %0 : vector<1x8x32xf32> to vector<8x32xf32>
    %c0_2 = arith.constant 0 : index
    %c0_3 = arith.constant 0 : index
    %2 = vector.load %arg2[%c0_2, %c0_3] : memref<1x32xf32, #tpu.memory_space<vmem>>, vector<1x32xf32>
    %c0_4 = arith.constant 0 : index
    %c0_5 = arith.constant 0 : index
    %3 = vector.load %arg3[%c0_4, %c0_5] : memref<1x32xf32, #tpu.memory_space<vmem>>, vector<1x32xf32>
    %cst = arith.constant dense<0.000000e+00> : vector<8xf32>
    %4 = vector.multi_reduction <add>, %1, %cst [1] : vector<8x32xf32> to vector<8xf32>
    %5 = vector.shape_cast %4 : vector<8xf32> to vector<8x1xf32>
    %cst_6 = arith.constant 3.200000e+01 : f32
    %6 = vector.broadcast %cst_6 : f32 to vector<8x1xf32>
    %7 = arith.divf %5, %6 : vector<8x1xf32>
    %8 = arith.mulf %1, %1 : vector<8x32xf32>
    %cst_7 = arith.constant dense<0.000000e+00> : vector<8xf32>
    %9 = vector.multi_reduction <add>, %8, %cst_7 [1] : vector<8x32xf32> to vector<8xf32>
    %10 = vector.shape_cast %9 : vector<8xf32> to vector<8x1xf32>
    %cst_8 = arith.constant 3.200000e+01 : f32
    %11 = vector.broadcast %cst_8 : f32 to vector<8x1xf32>
    %12 = arith.divf %10, %11 : vector<8x1xf32>
    %13 = arith.mulf %7, %7 : vector<8x1xf32>
    %14 = arith.subf %12, %13 : vector<8x1xf32>
    %15 = vector.broadcast %7 : vector<8x1xf32> to vector<8x32xf32>
    %16 = arith.subf %1, %15 : vector<8x32xf32>
    %cst_9 = arith.constant 9.99999974E-6 : f32
    %17 = vector.broadcast %cst_9 : f32 to vector<8x1xf32>
    %18 = arith.addf %14, %17 : vector<8x1xf32>
    %19 = math.rsqrt %18 : vector<8x1xf32>
    %20 = vector.broadcast %19 : vector<8x1xf32> to vector<8x32xf32>
    %21 = arith.mulf %16, %20 : vector<8x32xf32>
    %22 = vector.broadcast %2 : vector<1x32xf32> to vector<8x32xf32>
    %23 = arith.mulf %21, %22 : vector<8x32xf32>
    %24 = vector.broadcast %3 : vector<1x32xf32> to vector<8x32xf32>
    %25 = arith.addf %23, %24 : vector<8x32xf32>
    %26 = arith.truncf %25 : vector<8x32xf32> to vector<8x32xbf16>
    %c0_10 = arith.constant 0 : index
    %c0_11 = arith.constant 0 : index
    %27 = vector.load %arg4[%c0_10, %c0_11] : memref<32x96xbf16, #tpu.memory_space<vmem>>, vector<32x96xbf16>
    %cst_12 = arith.constant dense<0.000000e+00> : vector<8x96xf32>
    %28 = tpu.matmul %26, %27, %cst_12 {dimension_numbers = #tpu.dot_dimension_numbers<[1], [0], [0], [1], [0, 0, 1, 1], [], []>} : vector<8x32xbf16>, vector<32x96xbf16>, vector<8x96xf32> -> vector<8x96xf32>
    %29 = vector.extract_strided_slice %28 {offsets = [0, 0], sizes = [8, 32], strides = [1, 1]} : vector<8x96xf32> to vector<8x32xf32>
    %30 = vector.shape_cast %29 : vector<8x32xf32> to vector<8x4x8xf32>
    %31 = tpu.transpose %30, [1, 0, 2] : vector<8x4x8xf32> -> vector<4x8x8xf32>
    %32 = vector.extract_strided_slice %28 {offsets = [0, 32], sizes = [8, 32], strides = [1, 1]} : vector<8x96xf32> to vector<8x32xf32>
    %33 = vector.shape_cast %32 : vector<8x32xf32> to vector<8x4x8xf32>
    %34 = tpu.transpose %33, [1, 0, 2] : vector<8x4x8xf32> -> vector<4x8x8xf32>
    %35 = vector.extract_strided_slice %28 {offsets = [0, 64], sizes = [8, 32], strides = [1, 1]} : vector<8x96xf32> to vector<8x32xf32>
    %36 = vector.shape_cast %35 : vector<8x32xf32> to vector<8x4x8xf32>
    %37 = tpu.transpose %36, [1, 0, 2] : vector<8x4x8xf32> -> vector<4x8x8xf32>
    %38 = arith.truncf %31 : vector<4x8x8xf32> to vector<4x8x8xbf16>
    %39 = arith.truncf %34 : vector<4x8x8xf32> to vector<4x8x8xbf16>
    "tpu.trace_start"() <{level = 10 : i32, message = "hnd,hmd->hnm"}> : () -> ()
    %cst_13 = arith.constant dense<0.000000e+00> : vector<4x8x8xf32>
    %40 = tpu.matmul %38, %39, %cst_13 {dimension_numbers = #tpu.dot_dimension_numbers<[2], [2], [1], [1], [0, 0, 0, 1, 1, 1], [0], [0]>} : vector<4x8x8xbf16>, vector<4x8x8xbf16>, vector<4x8x8xf32> -> vector<4x8x8xf32>
    "tpu.trace_stop"() : () -> ()
    %cst_14 = arith.constant dense<0xFF800000> : vector<4x8xf32>
    %41 = vector.multi_reduction <maximumf>, %40, %cst_14 [2] : vector<4x8x8xf32> to vector<4x8xf32>
    %42 = vector.shape_cast %41 : vector<4x8xf32> to vector<4x8x1xf32>
    %43 = vector.broadcast %42 : vector<4x8x1xf32> to vector<4x8x8xf32>
    %44 = arith.subf %40, %43 : vector<4x8x8xf32>
    %45 = math.exp %44 : vector<4x8x8xf32>
    %cst_15 = arith.constant dense<0.000000e+00> : vector<4x8xf32>
    %46 = vector.multi_reduction <add>, %45, %cst_15 [2] : vector<4x8x8xf32> to vector<4x8xf32>
    %47 = vector.shape_cast %46 : vector<4x8xf32> to vector<4x8x1xf32>
    %48 = arith.truncf %45 : vector<4x8x8xf32> to vector<4x8x8xbf16>
    %49 = arith.truncf %37 : vector<4x8x8xf32> to vector<4x8x8xbf16>
    "tpu.trace_start"() <{level = 10 : i32, message = "hnm,hmd->hnd"}> : () -> ()
    %cst_16 = arith.constant dense<0.000000e+00> : vector<4x8x8xf32>
    %50 = tpu.matmul %48, %49, %cst_16 {dimension_numbers = #tpu.dot_dimension_numbers<[2], [1], [1], [2], [0, 0, 0, 1, 1, 2], [0], [0]>} : vector<4x8x8xbf16>, vector<4x8x8xbf16>, vector<4x8x8xf32> -> vector<4x8x8xf32>
    "tpu.trace_stop"() : () -> ()
    %51 = tpu.reciprocal %47 {approx = true} : vector<4x8x1xf32> -> vector<4x8x1xf32>
    %52 = vector.broadcast %51 : vector<4x8x1xf32> to vector<4x8x8xf32>
    %53 = arith.mulf %50, %52 : vector<4x8x8xf32>
    %54 = tpu.transpose %53, [1, 0, 2] : vector<4x8x8xf32> -> vector<8x4x8xf32>
    %55 = vector.shape_cast %54 : vector<8x4x8xf32> to vector<8x32xf32>
    %56 = arith.truncf %55 : vector<8x32xf32> to vector<8x32xbf16>
    %c0_17 = arith.constant 0 : index
    %c0_18 = arith.constant 0 : index
    %57 = vector.load %arg5[%c0_17, %c0_18] : memref<32x32xbf16, #tpu.memory_space<vmem>>, vector<32x32xbf16>
    %cst_19 = arith.constant dense<0.000000e+00> : vector<8x32xf32>
    %58 = tpu.matmul %56, %57, %cst_19 {dimension_numbers = #tpu.dot_dimension_numbers<[1], [0], [0], [1], [0, 0, 1, 1], [], []>} : vector<8x32xbf16>, vector<32x32xbf16>, vector<8x32xf32> -> vector<8x32xf32>
    %c0_20 = arith.constant 0 : index
    %c0_21 = arith.constant 0 : index
    %59 = vector.load %arg6[%c0_20, %c0_21] : memref<1x32xf32, #tpu.memory_space<vmem>>, vector<1x32xf32>
    %60 = vector.broadcast %59 : vector<1x32xf32> to vector<8x32xf32>
    %61 = arith.addf %58, %60 : vector<8x32xf32>
    %62 = arith.addf %1, %61 : vector<8x32xf32>
    %c0_22 = arith.constant 0 : index
    %c0_23 = arith.constant 0 : index
    %63 = vector.load %arg7[%c0_22, %c0_23] : memref<1x32xf32, #tpu.memory_space<vmem>>, vector<1x32xf32>
    %c0_24 = arith.constant 0 : index
    %c0_25 = arith.constant 0 : index
    %64 = vector.load %arg8[%c0_24, %c0_25] : memref<1x32xf32, #tpu.memory_space<vmem>>, vector<1x32xf32>
    %cst_26 = arith.constant dense<0.000000e+00> : vector<8xf32>
    %65 = vector.multi_reduction <add>, %62, %cst_26 [1] : vector<8x32xf32> to vector<8xf32>
    %66 = vector.shape_cast %65 : vector<8xf32> to vector<8x1xf32>
    %cst_27 = arith.constant 3.200000e+01 : f32
    %67 = vector.broadcast %cst_27 : f32 to vector<8x1xf32>
    %68 = arith.divf %66, %67 : vector<8x1xf32>
    %69 = arith.mulf %62, %62 : vector<8x32xf32>
    %cst_28 = arith.constant dense<0.000000e+00> : vector<8xf32>
    %70 = vector.multi_reduction <add>, %69, %cst_28 [1] : vector<8x32xf32> to vector<8xf32>
    %71 = vector.shape_cast %70 : vector<8xf32> to vector<8x1xf32>
    %cst_29 = arith.constant 3.200000e+01 : f32
    %72 = vector.broadcast %cst_29 : f32 to vector<8x1xf32>
    %73 = arith.divf %71, %72 : vector<8x1xf32>
    %74 = arith.mulf %68, %68 : vector<8x1xf32>
    %75 = arith.subf %73, %74 : vector<8x1xf32>
    %76 = vector.broadcast %68 : vector<8x1xf32> to vector<8x32xf32>
    %77 = arith.subf %62, %76 : vector<8x32xf32>
    %cst_30 = arith.constant 9.99999974E-6 : f32
    %78 = vector.broadcast %cst_30 : f32 to vector<8x1xf32>
    %79 = arith.addf %75, %78 : vector<8x1xf32>
    %80 = math.rsqrt %79 : vector<8x1xf32>
    %81 = vector.broadcast %80 : vector<8x1xf32> to vector<8x32xf32>
    %82 = arith.mulf %77, %81 : vector<8x32xf32>
    %83 = vector.broadcast %63 : vector<1x32xf32> to vector<8x32xf32>
    %84 = arith.mulf %82, %83 : vector<8x32xf32>
    %85 = vector.broadcast %64 : vector<1x32xf32> to vector<8x32xf32>
    %86 = arith.addf %84, %85 : vector<8x32xf32>
    %87 = arith.truncf %86 : vector<8x32xf32> to vector<8x32xbf16>
    %c0_31 = arith.constant 0 : index
    %c0_32 = arith.constant 0 : index
    %88 = vector.load %arg9[%c0_31, %c0_32] : memref<32x128xbf16, #tpu.memory_space<vmem>>, vector<32x128xbf16>
    %cst_33 = arith.constant dense<0.000000e+00> : vector<8x128xf32>
    %89 = tpu.matmul %87, %88, %cst_33 {dimension_numbers = #tpu.dot_dimension_numbers<[1], [0], [0], [1], [0, 0, 1, 1], [], []>} : vector<8x32xbf16>, vector<32x128xbf16>, vector<8x128xf32> -> vector<8x128xf32>
    %c0_34 = arith.constant 0 : index
    %c0_35 = arith.constant 0 : index
    %90 = vector.load %arg10[%c0_34, %c0_35] : memref<1x128xf32, #tpu.memory_space<vmem>>, vector<1x128xf32>
    %91 = vector.broadcast %90 : vector<1x128xf32> to vector<8x128xf32>
    %92 = arith.addf %89, %91 : vector<8x128xf32>
    %cst_36 = arith.constant 5.000000e-01 : f32
    %93 = vector.broadcast %cst_36 : f32 to vector<8x128xf32>
    %94 = arith.mulf %93, %92 : vector<8x128xf32>
    %cst_37 = arith.constant 0.707106769 : f32
    %95 = vector.broadcast %cst_37 : f32 to vector<8x128xf32>
    %96 = arith.mulf %92, %95 : vector<8x128xf32>
    %97 = math.erf %96 : vector<8x128xf32>
    %cst_38 = arith.constant 1.000000e+00 : f32
    %98 = vector.broadcast %cst_38 : f32 to vector<8x128xf32>
    %99 = arith.addf %98, %97 : vector<8x128xf32>
    %100 = arith.mulf %94, %99 : vector<8x128xf32>
    %101 = arith.truncf %100 : vector<8x128xf32> to vector<8x128xbf16>
    %c0_39 = arith.constant 0 : index
    %c0_40 = arith.constant 0 : index
    %102 = vector.load %arg11[%c0_39, %c0_40] : memref<128x32xbf16, #tpu.memory_space<vmem>>, vector<128x32xbf16>
    %cst_41 = arith.constant dense<0.000000e+00> : vector<8x32xf32>
    %103 = tpu.matmul %101, %102, %cst_41 {dimension_numbers = #tpu.dot_dimension_numbers<[1], [0], [0], [1], [0, 0, 1, 1], [], []>} : vector<8x128xbf16>, vector<128x32xbf16>, vector<8x32xf32> -> vector<8x32xf32>
    %c0_42 = arith.constant 0 : index
    %c0_43 = arith.constant 0 : index
    %104 = vector.load %arg12[%c0_42, %c0_43] : memref<1x32xf32, #tpu.memory_space<vmem>>, vector<1x32xf32>
    %105 = vector.broadcast %104 : vector<1x32xf32> to vector<8x32xf32>
    %106 = arith.addf %103, %105 : vector<8x32xf32>
    %107 = arith.addf %62, %106 : vector<8x32xf32>
    %c0_44 = arith.constant 0 : index
    %c0_45 = arith.constant 0 : index
    %c0_46 = arith.constant 0 : index
    %108 = vector.load %arg13[%c0_44, %c0_45, %c0_46] : memref<1x8x32xf32, #tpu.memory_space<vmem>>, vector<1x8x32xf32>
    %109 = vector.shape_cast %108 : vector<1x8x32xf32> to vector<8x32xf32>
    %110 = vector.shape_cast %107 : vector<8x32xf32> to vector<1x8x32xf32>
    tpu.vector_store %arg13[%c0_44, %c0_45, %c0_46], %110 {strides = array<i32>} : memref<1x8x32xf32, #tpu.memory_space<vmem>>, vector<1x8x32xf32>,
    return
  }
  func.func @transform_0(%arg0: i32) -> (i32, i32, i32) {
    %c0_i32 = arith.constant 0 : i32
    %c0_i32_0 = arith.constant 0 : i32
    %c0_i32_1 = arith.constant 0 : i32
    return %arg0, %c0_i32, %c0_i32_0 : i32, i32, i32
  }
  func.func @transform_1(%arg0: i32) -> (i32, i32) {
    %c0_i32 = arith.constant 0 : i32
    %c0_i32_0 = arith.constant 0 : i32
    %c0_i32_1 = arith.constant 0 : i32
    return %c0_i32, %c0_i32_0 : i32, i32
  }
  func.func @transform_2(%arg0: i32) -> (i32, i32) {
    %c0_i32 = arith.constant 0 : i32
    %c0_i32_0 = arith.constant 0 : i32
    %c0_i32_1 = arith.constant 0 : i32
    return %c0_i32, %c0_i32_0 : i32, i32
  }
  func.func @transform_3(%arg0: i32) -> (i32, i32) {
    %c0_i32 = arith.constant 0 : i32
    %c0_i32_0 = arith.constant 0 : i32
    %c0_i32_1 = arith.constant 0 : i32
    return %c0_i32, %c0_i32_0 : i32, i32
  }
  func.func @transform_4(%arg0: i32) -> (i32, i32) {
    %c0_i32 = arith.constant 0 : i32
    %c0_i32_0 = arith.constant 0 : i32
    %c0_i32_1 = arith.constant 0 : i32
    return %c0_i32, %c0_i32_0 : i32, i32
  }
  func.func @transform_5(%arg0: i32) -> (i32, i32) {
    %c0_i32 = arith.constant 0 : i32
    %c0_i32_0 = arith.constant 0 : i32
    %c0_i32_1 = arith.constant 0 : i32
    return %c0_i32, %c0_i32_0 : i32, i32
  }
  func.func @transform_6(%arg0: i32) -> (i32, i32) {
    %c0_i32 = arith.constant 0 : i32
    %c0_i32_0 = arith.constant 0 : i32
    %c0_i32_1 = arith.constant 0 : i32
    return %c0_i32, %c0_i32_0 : i32, i32
  }
  func.func @transform_7(%arg0: i32) -> (i32, i32) {
    %c0_i32 = arith.constant 0 : i32
    %c0_i32_0 = arith.constant 0 : i32
    %c0_i32_1 = arith.constant 0 : i32
    return %c0_i32, %c0_i32_0 : i32, i32
  }
  func.func @transform_8(%arg0: i32) -> (i32, i32) {
    %c0_i32 = arith.constant 0 : i32
    %c0_i32_0 = arith.constant 0 : i32
    %c0_i32_1 = arith.constant 0 : i32
    return %c0_i32, %c0_i32_0 : i32, i32
  }
  func.func @transform_9(%arg0: i32) -> (i32, i32) {
    %c0_i32 = arith.constant 0 : i32
    %c0_i32_0 = arith.constant 0 : i32
    %c0_i32_1 = arith.constant 0 : i32
    return %c0_i32, %c0_i32_0 : i32, i32
  }
  func.func @transform_10(%arg0: i32) -> (i32, i32) {
    %c0_i32 = arith.constant 0 : i32
    %c0_i32_0 = arith.constant 0 : i32
    %c0_i32_1 = arith.constant 0 : i32
    return %c0_i32, %c0_i32_0 : i32, i32
  }
  func.func @transform_11(%arg0: i32) -> (i32, i32) {
    %c0_i32 = arith.constant 0 : i32
    %c0_i32_0 = arith.constant 0 : i32
    %c0_i32_1 = arith.constant 0 : i32
    return %c0_i32, %c0_i32_0 : i32, i32
  }
  func.func @transform_12(%arg0: i32) -> (i32, i32, i32) {
    %c0_i32 = arith.constant 0 : i32
    %c0_i32_0 = arith.constant 0 : i32
    %c0_i32_1 = arith.constant 0 : i32
    return %arg0, %c0_i32, %c0_i32_0 : i32, i32, i32
  }
}

</mosaic_0001>

<bundles_post_ra>
// kernel: tpu_custom_call.1
= control target key start
LH: loop header
LB: loop body
LE: loop exit
PB: predicated region body
PF: predicated region fallthrough
CT: control target
= control target key end

     0   :  { %s2643_s0 = inlined_call_operand.vmem [shape: f32[2,8,32], index: 0, kind: input, shape index: {}]   ;;  %s2644_s1 = inlined_call_operand.vmem [shape: f32[1,32], index: 1, kind: input, shape index: {}]   ;;  %s2645_s2 = inlined_call_operand.vmem [shape: f32[1,32], index: 2, kind: input, shape index: {}]   ;;  %s2646_s3 = inlined_call_operand.vmem [shape: bf16[32,96], index: 3, kind: input, shape index: {}]   ;;  %s2647_s4 = inlined_call_operand.vmem [shape: bf16[32,32], index: 4, kind: input, shape index: {}]   ;;  %s2648_s5 = inlined_call_operand.vmem [shape: f32[1,32], index: 5, kind: input, shape index: {}]   ;;  %s2649_s6 = inlined_call_operand.vmem [shape: f32[1,32], index: 6, kind: input, shape index: {}]   ;;  %s2650_s7 = inlined_call_operand.vmem [shape: f32[1,32], index: 7, kind: input, shape index: {}]   ;;  %s2651_s8 = inlined_call_operand.vmem [shape: bf16[32,128], index: 8, kind: input, shape index: {}]   ;;  %s2652_s9 = inlined_call_operand.vmem [shape: f32[1,128], index: 9, kind: input, shape index: {}]   ;;  %s2653_s10 = inlined_call_operand.vmem [shape: bf16[128,32], index: 10, kind: input, shape index: {}]   ;;  %s2654_s11 = inlined_call_operand.vmem [shape: f32[1,32], index: 11, kind: input, shape index: {}]   ;;  %s2655_s12 = inlined_call_operand.hbm [shape: f32[2,8,32], index: 12, kind: output, shape index: {}]  }
   0x1   :  { %2656 = sst [smem:[#allocation5_spill]] %s2643_s0 }
   0x2   :  { %2657 = sst [smem:[#allocation6_spill]] %s2644_s1 }
   0x3   :  { %17 = vsyncpa [#allocation3], 0 }
   0x4   :  { %19 = vsyncpa [#allocation3 + $0x1], 0  ;;  %s2290_s21 = smov 0   ;;  %s2292_s22 = smov 0  }
   0x5   :  { %s2294_s23 = smov 0   ;;  %s2296_s24 = smov 0  }
   0x6 LB: > { %s2311_s25 = sadd.s32 4294967295, %s2210_s24   ;;  %s1887_s26 = sadd.s32 4294967294, %s2210_s24   ;;  %s2210_s24 = sphi %s2296_s24, %s2665_s24   ;;  %s2206_s23 = sphi %s2294_s23, %s2664_s23   ;;  %s2202_s22 = sphi %s2292_s22, %s2663_s22   ;;  %s2198_s21 = sphi %s2290_s21, %s2662_s21  }
   0x7   : > { %s2315_s27 = sadd.s32 1, %s2210_s24   ;;  %s289_s28 = sadd.s32 1, %s2206_s23 }
   0x8   : > { %s286_s29 = ssub.s32 %s2210_s24, %s2315_s27  ;;  %p299_p0 = scmp.ne.s32.totalorder %s2206_s23, %s2202_s22 }
   0x9   : > { %p287_p1 = scmp.eq.s32.totalorder %s286_s29, 0  ;;  %p300_p2 = scmp.eq.s32.totalorder %s2311_s25, 1 }
   0xa   : > { %p305_p3 = scmp.ne.s32.totalorder %s2202_s22, %s2198_s21  ;;  %p306_p4 = scmp.eq.s32.totalorder %s1887_s26, 1 }
   0xb   : > { %s2326_s30 = scalar_select %p287_p1, %s2206_s23, %s289_s28  }
   0xc   : > { %p2328_p5 = por %p300_p2, %p299_p0  ;;  %p2332_p6 = por %p306_p4, %p305_p3 }
   0xd   : > { %p1890_p7 = scmp.ge.s32.totalorder %s2210_s24, 1  ;;  %p364_p8 = scmp.lt.s32.totalorder %s2210_s24, 3 }
   0xf   : > { %p365_p9 = pnand %p1890_p7, %p364_p8 }
  0x10   : > { %p405_p10 = scmp.lt.s32.totalorder (!%p365_p9), %s2311_s25, 1  ;;  %s2660_s0 = sld [smem:[#allocation5_spill]] (!%p365_p9) }
  0x11   : > { %368 = sbr.rel (%p365_p9) target bundleno = 2199 (0x897), region = 68  ;;  %s2661_s1 = sld [smem:[#allocation6_spill]] (!%p365_p9) }
  0x12   : > { %s2215_s20 = smov (!%p365_p9), 120   ;;  %s2216_s26 = smov (!%p365_p9), 112  }
  0x13   : > { %s2217_s28 = smov (!%p365_p9), 96   ;;  %s2218_s29 = smov (!%p365_p9), 64  }
  0x14   : > { %s1934_s18 = sshll.u32 (!%p365_p9), %s2311_s25, 7 }
  0x16   : > { %s406_s15 = scalar_select %p405_p10, %s2311_s25, 1  ;;  %vm413_vm0 = vcmask 261120   ;;  %v2114_v4 = vld [vmem:[%s2646_s3 + $0x8] sm:$0xff]   ;;  %v2212_v5 = vmov 0.0   ;;  %vm2213_vm1 = vmmov 0   ;;  %v2115_v6 = vld [vmem:[%s2646_s3] sm:$0xff]   ;;  %v519_v31 = vlaneseq }
  0x17   : > { %1971 = vmatprep.subr.bf16.mxu0 %v2212_v5  ;;  %1975 = vmatprep.mubr.msk.bf16.mxu0 %vm2213_vm1, %v2212_v5  ;;  %v1893_v16 = vld [vmem:[%s2661_s1] ss:$0 sm:$0xff]  ;;  %v2219_v29 = vmov 1983009808   ;;  %v2220_v35 = vmov 1934713408  }
  0x18   : > { %s1892_s16 = sshll.u32 %s406_s15, 3  ;;  %1972 = vmatpush3.bf16.msra.mxu0 %v2114_v4  ;;  %1991 = vmatprep.subr.bf16.mxu1 %v2212_v5  ;;  %v1894_v18 = vld [vmem:[%s2645_s2] ss:$0 sm:$0xff]  ;;  %v517_v30 = vunpack.c.l.s4 %v2219_v29  ;;  %v520_v33 = vshrl.u32 %v519_v31, 7  ;;  %v549_v36 = vunpack.c.l.s4 %v2220_v35  ;;  %vm954_vm2 = vcmask 64512  }
  0x19   : > { %s408_s19 = scalar_lea.vmem %s2660_s0, %s1892_s16  ;;  %1973 = vmatprep.subr.bf16.mxu0 %v2212_v5  ;;  %1993 = vmatprep.mubr.msk.bf16.mxu1 %vm2213_vm1, %v2212_v5  ;;  %vm1186_vm3 = vcmask 1043456   ;;  %vm1525_vm4 = vcmask 130048   ;;  %vm1527_vm5 = vcmask 195584   ;;  %s2601_s0 = scalar_lea.hbm %s2655_s12, %s1934_s18 }
  0x1a   : > { %v2343_v0 = vld [vmem:[%s408_s19] sm:$0xff]  ;;  %s2214_s19 = smov 104   ;;  %v518_v32 = vunpack.c.0.s8 %v517_v30  ;;  %v550_v43 = vunpack.c.0.s8 %v549_v36  ;;  %s2224_s16 = smov [#allocation2]  }
  0x1b   : > { %v414_v1 = vsel %vm413_vm0, %v2343_v0, 0.0  ;;  %v419_v2 = vmul.f32 %v2343_v0, %v2343_v0  ;;  %s2154_s17 = sshll.u32 %s2224_s16, 4  ;;  %s2155_s17 = int_to_ptr.vmem [resolvable:$false] %s2154_s17 }
  0x1c   : > { %415 = vadd.xlane.f32.xlu0 %v414_v1  ;;  %1974 = vmatpush3.bf16.msra.mxu0 %v2115_v6  ;;  %v2386_v39 = vsub.s32 %v518_v32, %v520_v33  ;;  %v2396_v49 = vsub.s32 %v550_v43, %v520_v33  ;;  %s2156_s18 = scalar_lea.vmem %s2155_s17, 256 }
  0x1d   : > { %v420_v3 = vsel %vm413_vm0, %v419_v2, 0.0  ;;  %1979 = vmatprep.subr.bf16.mxu0 %v2212_v5 }
  0x20   : > { %421 = vadd.xlane.f32.xlu0 %v420_v3 }
  0xa5   : > { %v416_v7 = vpop.xlane.xlu0 %415 }
  0xa6   : > { %v418_v8 = vmul.f32 0.03125, %v416_v7 }
  0xa8   : > { %v424_v10 = vmul.f32 %v418_v8, %v418_v8  ;;  %v426_v14 = vsub.f32 %v2343_v0, %v418_v8 }
  0xa9   : > { %v422_v9 = vpop.xlane.xlu0 %421 }
  0xaa   : > { %v423_v11 = vmul.f32 0.03125, %v422_v9 }
  0xac   : > { %v425_v12 = vsub.f32 %v423_v11, %v424_v10 }
  0xae   : > { %v427_v13 = vadd.f32 1e-05, %v425_v12 }
  0xb0   : > { %2128 = vrsqrt.f32 %v427_v13 }
  0xbd   : > { %v2129_v15 = vpop.eup %2128 }
  0xbe   : > { %v429_v17 = vmul.f32 %v2129_v15, %v426_v14 }
  0xc0   : > { %v436_v19 = vmul.f32 %v1893_v16, %v429_v17 }
  0xc2   : > { %v443_v20 = vadd.f32 %v1894_v18, %v436_v19 }
  0xc4   : > { %v444_v21 = vpack.c.bf16 %v443_v20, %v443_v20 }
  0xc6   : > { %1976 = vmatmul.mubr.msk.bf16.vlgmr.msra.gmra.mxu0 %vm413_vm0, %v444_v21 }
  0xc7   : > { %1981 = vmatprep.mubr.msk.bf16.mxu0 %vm2213_vm1, %v2212_v5 }
 0x186   : > { %v498_v22 = vpop.f32.mrf.mxu0 }
 0x187   : > { %511 = vrot.lane.b32.xlu0 %v498_v22, %s2214_s19  ;;  %505 = vrot.lane.b32.xlu1 %v498_v22, %s2215_s20  ;;  %s2221_s19 = smov 16   ;;  %s2222_s20 = smov 8  }
 0x188   : > { %v1977_v23 = vpop.f32.mrf.mxu0 }
 0x18a   : > { %v501_v24 = vpop.f32.mrf.mxu0 }
 0x18b   : > { %508 = vrot.lane.b32.xlu1 %v498_v22, %s2216_s26  ;;  %s2223_s26 = smov 24  }
 0x18c   : > { %v1978_v25 = vpop.f32.mrf.mxu0 }
 0x18f   : > { %650 = vrot.lane.b32.xlu1 %v498_v22, %s2217_s28 }
 0x1f9   : > { %v2374_v26 = vpop.permute.xlu1 %505  ;;  %v2380_v28 = vpop.permute.xlu0 %511 }
 0x1fa   : > { %652 = vrot.lane.b32.xlu1 %v2374_v26, %s2217_s28  ;;  %v530_v40 = vcombine.low %v2374_v26, %v2380_v28  ;;  %v531_v41 = vcombine.high %v2374_v26, %v2380_v28 }
 0x1fc   : > { %v538_v46 = vrot.slane %v530_v40, %v2386_v39  ;;  %v545_v47 = vrot.slane %v531_v41, %v2386_v39 }
 0x1fd   : > { %v2377_v27 = vpop.permute.xlu1 %508 }
 0x1fe   : > { %654 = vrot.lane.b32.xlu1 %v2377_v27, %s2217_s28  ;;  %v514_v37 = vcombine.low %v498_v22, %v2377_v27  ;;  %v515_v38 = vcombine.high %v498_v22, %v2377_v27 }
 0x200   : > { %v522_v44 = vrot.slane %v514_v37, %v2386_v39  ;;  %v529_v45 = vrot.slane %v515_v38, %v2386_v39 }
 0x201   : > { %v651_v34 = vpop.permute.xlu1 %650 }
 0x202   : > { %656 = vrot.lane.b32.xlu1 %v2380_v28, %s2217_s28  ;;  %v546_v50 = vcombine.low %v522_v44, %v538_v46  ;;  %v547_v51 = vcombine.high %v522_v44, %v538_v46  ;;  %v562_v52 = vcombine.low %v529_v45, %v545_v47  ;;  %v563_v53 = vcombine.high %v529_v45, %v545_v47 }
 0x204   : > { %v554_v59 = vrot.slane %v546_v50, %v2396_v49  ;;  %v561_v60 = vrot.slane %v547_v51, %v2396_v49  ;;  %v570_v61 = vrot.slane %v562_v52, %v2396_v49  ;;  %v577_v62 = vrot.slane %v563_v53, %v2396_v49 }
 0x206   : > { %798 = vrot.lane.b32.xlu1 %v498_v22, %s2218_s29  ;;  %v582_v9 = vcombine.low %v554_v59, %v561_v60  ;;  %v1898_v10 = vcombine.high %v554_v59, %v561_v60  ;;  %v598_v11 = vcombine.low %v570_v61, %v577_v62  ;;  %v1899_v12 = vcombine.high %v570_v61, %v577_v62 }
 0x208   : > { %v589_v21 = vrot.slane %v582_v9, %v2386_v39  ;;  %v597_v22 = vrot.slane %v1898_v10, %v2386_v39  ;;  %v605_v23 = vrot.slane %v598_v11, %v2386_v39  ;;  %v613_v24 = vrot.slane %v1899_v12, %v2386_v39 }
 0x20a   : > { %v614_v36 = vcombine.low %v589_v21, %v597_v22  ;;  %v630_v37 = vcombine.low %v605_v23, %v613_v24  ;;  %v615_v38 = vcombine.high %v589_v21, %v597_v22  ;;  %v631_v40 = vcombine.high %v605_v23, %v613_v24 }
 0x20c   : > { %v622_v47 = vrot.slane %v614_v36, %v2396_v49  ;;  %v629_v52 = vrot.slane %v615_v38, %v2396_v49  ;;  %v645_v53 = vrot.slane %v631_v40, %v2396_v49 }
 0x26c   : > { %v653_v42 = vpop.permute.xlu1 %652 }
 0x270   : > { %v655_v48 = vpop.permute.xlu1 %654 }
 0x271   : > { %v662_v54 = vcombine.low %v651_v34, %v655_v48  ;;  %v663_v55 = vcombine.high %v651_v34, %v655_v48  ;;  %v638_v48 = vrot.slane %v630_v37, %v2396_v49 }
 0x273   : > { %v670_v63 = vrot.slane %v662_v54, %v2386_v39  ;;  %v677_v1 = vrot.slane %v663_v55, %v2386_v39 }
 0x274   : > { %v657_v56 = vpop.permute.xlu1 %656 }
 0x275   : > { %v678_v57 = vcombine.low %v653_v42, %v657_v56  ;;  %v679_v58 = vcombine.high %v653_v42, %v657_v56 }
 0x277   : > { %v686_v2 = vrot.slane %v678_v57, %v2386_v39  ;;  %v693_v3 = vrot.slane %v679_v58, %v2386_v39  ;;  %v646_v57 = vcombine.low %v622_v47, %v638_v48  ;;  %v648_v58 = vcombine.low %v629_v52, %v645_v53 }
 0x279   : > { %v694_v4 = vcombine.low %v670_v63, %v686_v2  ;;  %v695_v6 = vcombine.high %v670_v63, %v686_v2  ;;  %v710_v7 = vcombine.low %v677_v1, %v693_v3  ;;  %v711_v8 = vcombine.high %v677_v1, %v693_v3 }
 0x27a   : > { %v946_v60 = vpack.c.bf16 %v646_v57, %v646_v57  ;;  %v948_v61 = vpack.c.bf16 %v648_v58, %v648_v58  ;;  %v647_v1 = vcombine.high %v622_v47, %v638_v48 }
 0x27b   : > { %v702_v13 = vrot.slane %v694_v4, %v2396_v49  ;;  %v709_v14 = vrot.slane %v695_v6, %v2396_v49  ;;  %v718_v15 = vrot.slane %v710_v7, %v2396_v49  ;;  %v725_v16 = vrot.slane %v711_v8, %v2396_v49 }
 0x27c   : > { %v947_v3 = vpack.c.bf16 %v647_v1, %v647_v1  ;;  %v649_v6 = vcombine.high %v629_v52, %v645_v53 }
 0x27d   : > { %v730_v17 = vcombine.low %v702_v13, %v709_v14  ;;  %v1900_v18 = vcombine.high %v702_v13, %v709_v14  ;;  %v746_v19 = vcombine.low %v718_v15, %v725_v16  ;;  %v1901_v20 = vcombine.high %v718_v15, %v725_v16 }
 0x27e   : > { %v949_v7 = vpack.c.bf16 %v649_v6, %v649_v6 }
 0x27f   : > { %v737_v25 = vrot.slane %v730_v17, %v2386_v39  ;;  %v745_v29 = vrot.slane %v1900_v18, %v2386_v39  ;;  %v753_v30 = vrot.slane %v746_v19, %v2386_v39  ;;  %v761_v31 = vrot.slane %v1901_v20, %v2386_v39 }
 0x281   : > { %v762_v32 = vcombine.low %v737_v25, %v745_v29  ;;  %v778_v33 = vcombine.low %v753_v30, %v761_v31  ;;  %v763_v34 = vcombine.high %v737_v25, %v745_v29  ;;  %v779_v35 = vcombine.high %v753_v30, %v761_v31  ;;  %v799_v31 = vpop.permute.xlu1 %798 }
 0x283   : > { %v770_v41 = vrot.slane %v762_v32, %v2396_v49  ;;  %v786_v42 = vrot.slane %v778_v33, %v2396_v49  ;;  %v777_v43 = vrot.slane %v763_v34, %v2396_v49  ;;  %v793_v44 = vrot.slane %v779_v35, %v2396_v49 }
 0x285   : > { %v794_v45 = vcombine.low %v770_v41, %v786_v42  ;;  %v796_v46 = vcombine.low %v777_v43, %v793_v44  ;;  %v795_v56 = vcombine.high %v770_v41, %v786_v42  ;;  %v797_v63 = vcombine.high %v777_v43, %v793_v44 }
 0x287   : > { %v950_v50 = vpack.c.bf16 %v794_v45, %v794_v45  ;;  %v952_v51 = vpack.c.bf16 %v796_v46, %v796_v46  ;;  %v951_v59 = vpack.c.bf16 %v795_v56, %v795_v56  ;;  %v953_v2 = vpack.c.bf16 %v797_v63, %v797_v63 }
 0x289   : > { %v959_v54 = vsel %vm954_vm2, %v950_v50, 0  ;;  %v1051_v55 = vsel %vm954_vm2, %v952_v51, 0  ;;  %v1005_v62 = vsel %vm954_vm2, %v951_v59, 0  ;;  %v1097_v4 = vsel %vm954_vm2, %v953_v2, 0 }
 0x28a   : > { %1980 = vmatpush3.bf16.xpose.msra.mxu0 %v959_v54  ;;  %1992 = vmatpush3.bf16.xpose.msra.mxu1 %v1051_v55 }
 0x28b   : > { %1985 = vmatprep.subr.bf16.mxu0 %v2212_v5  ;;  %2003 = vmatprep.subr.bf16.mxu1 %v2212_v5 }
 0x291   : > { %1982 = vmatmul.mubr.msk.bf16.vlgmr.msra.gmra.mxu0 %vm954_vm2, %v946_v60  ;;  %1994 = vmatmul.mubr.msk.bf16.vlgmr.msra.gmra.mxu1 %vm954_vm2, %v948_v61 }
 0x292   : > { %1986 = vmatpush3.bf16.xpose.msra.mxu0 %v1005_v62  ;;  %1987 = vmatprep.mubr.msk.bf16.mxu0 %vm2213_vm1, %v2212_v5 }
 0x293   : > { %1997 = vmatprep.subr.bf16.mxu0 %v2212_v5  ;;  %2005 = vmatprep.mubr.msk.bf16.mxu1 %vm2213_vm1, %v2212_v5 }
 0x299   : > { %1988 = vmatmul.mubr.msk.bf16.vlgmr.msra.gmra.mxu0 %vm954_vm2, %v947_v3 }
 0x29a   : > { %1998 = vmatpush3.bf16.xpose.msra.mxu0 %v1097_v4  ;;  %1999 = vmatprep.mubr.msk.bf16.mxu0 %vm2213_vm1, %v2212_v5 }
 0x29b   : > { %2009 = vmatprep.subr.bf16.mxu0 %v2212_v5 }
 0x2a1   : > { %2000 = vmatmul.mubr.msk.bf16.vlgmr.msra.gmra.mxu0 %vm954_vm2, %v949_v7 }
 0x2a2   : > { %2011 = vmatprep.mubr.msk.bf16.mxu0 %vm2213_vm1, %v2212_v5 }
 0x351   : > { %v995_v8 = vpop.f32.mrf.mxu0  ;;  %v2446_v9 = vpop.f32.mrf.mxu1 }
 0x352   : > { %v1139_v10 = vsel %vm954_vm2, %v995_v8, -inf  ;;  %v1145_v30 = vsel %vm954_vm2, %v2446_v9, -inf }
 0x353   : > { %v1995_v11 = vpop.f32.mrf.mxu1  ;;  %1140 = vmax.xlane.f32.xlu1 %v1139_v10  ;;  %v1983_v12 = vpop.f32.mrf.mxu0 }
 0x355   : > { %v998_v13 = vpop.f32.mrf.mxu0  ;;  %v1090_v14 = vpop.f32.mrf.mxu1 }
 0x357   : > { %v1984_v15 = vpop.f32.mrf.mxu0  ;;  %v1996_v16 = vpop.f32.mrf.mxu1 }
 0x359   : > { %v1041_v17 = vpop.f32.mrf.mxu0 }
 0x35a   : > { %v1142_v18 = vsel %vm954_vm2, %v1041_v17, -inf }
 0x35b   : > { %1143 = vmax.xlane.f32.xlu0 %v1142_v18  ;;  %v1989_v19 = vpop.f32.mrf.mxu0 }
 0x35d   : > { %v1044_v20 = vpop.f32.mrf.mxu0 }
 0x35f   : > { %v1990_v21 = vpop.f32.mrf.mxu0 }
 0x361   : > { %v2450_v22 = vpop.f32.mrf.mxu0 }
 0x362   : > { %v1148_v29 = vsel %vm954_vm2, %v2450_v22, -inf }
 0x363   : > { %v2001_v23 = vpop.f32.mrf.mxu0 }
 0x364   : > { %802 = vrot.lane.b32.xlu1 %v2377_v27, %s2218_s29 }
 0x365   : > { %v1136_v24 = vpop.f32.mrf.mxu0 }
 0x367   : > { %v2002_v25 = vpop.f32.mrf.mxu0 }
 0x368   : > { %804 = vrot.lane.b32.xlu1 %v2380_v28, %s2218_s29 }
 0x371   : > { %800 = vrot.lane.b32.xlu0 %v2374_v26, %s2218_s29  ;;  %s402_s29 = sand.u32 1, %s2202_s22  }
 0x372   : > { %s1891_s15 = sshll.u32 %s402_s29, 3  ;;  %s1815_s25 = scalar_lea.sflag [#allocation3], %s402_s29 }
 0x38c   : > { %1149 = vmax.xlane.f32.xlu1 %v1148_v29 }
 0x390   : > { %1146 = vmax.xlane.f32.xlu0 %v1145_v30 }
 0x3dc   : > { %v1141_v32 = vpop.xlane.xlu1 %1140 }
 0x3dd   : > { %v1151_v33 = vsub.f32 %v995_v8, %v1141_v32 }
 0x3df   : > { %v1155_v27 = vmul.f32 1.442695, %v1151_v33 }
 0x3e0   : > { %v803_v34 = vpop.permute.xlu1 %802 }
 0x3e1   : > { %2130 = vpow2.f32 %v1155_v27  ;;  %v810_v28 = vcombine.low %v799_v31, %v803_v34  ;;  %v811_v37 = vcombine.high %v799_v31, %v803_v34 }
 0x3e3   : > { %v818_v43 = vrot.slane %v810_v28, %v2386_v39  ;;  %v825_v44 = vrot.slane %v811_v37, %v2386_v39 }
 0x3e4   : > { %v1144_v35 = vpop.xlane.xlu0 %1143  ;;  %v805_v26 = vpop.permute.xlu1 %804 }
 0x3e5   : > { %v1152_v36 = vsub.f32 %v1041_v17, %v1144_v35 }
 0x3e7   : > { %v1157_v38 = vmul.f32 1.442695, %v1152_v36 }
 0x3e8   : > { %v801_v40 = vpop.permute.xlu0 %800 }
 0x3e9   : > { %2132 = vpow2.f32 %v1157_v38  ;;  %v826_v41 = vcombine.low %v801_v40, %v805_v26  ;;  %v827_v42 = vcombine.high %v801_v40, %v805_v26 }
 0x3eb   : > { %v834_v45 = vrot.slane %v826_v41, %v2386_v39  ;;  %v841_v46 = vrot.slane %v827_v42, %v2386_v39 }
 0x3ed   : > { %v842_v47 = vcombine.low %v818_v43, %v834_v45  ;;  %v843_v48 = vcombine.high %v818_v43, %v834_v45  ;;  %v858_v50 = vcombine.low %v825_v44, %v841_v46  ;;  %v859_v51 = vcombine.high %v825_v44, %v841_v46 }
 0x3ee   : > { %v2131_v52 = vpop.eup %2130 }
 0x3ef   : > { %v850_v53 = vrot.slane %v842_v47, %v2396_v49  ;;  %v857_v54 = vrot.slane %v843_v48, %v2396_v49  ;;  %v866_v55 = vrot.slane %v858_v50, %v2396_v49  ;;  %v873_v56 = vrot.slane %v859_v51, %v2396_v49 }
 0x3f0   : > { %v1163_v57 = vsel %vm954_vm2, %v2131_v52, 0.0  ;;  %v1175_v29 = vpack.c.bf16 %v2131_v52, %v2131_v52 }
 0x3f1   : > { %v878_v58 = vcombine.low %v850_v53, %v857_v54  ;;  %v1902_v59 = vcombine.high %v850_v53, %v857_v54  ;;  %v894_v60 = vcombine.low %v866_v55, %v873_v56  ;;  %v1903_v61 = vcombine.high %v866_v55, %v873_v56  ;;  %1164 = vadd.xlane.f32.xlu0 %v1163_v57 }
 0x3f3   : > { %v885_v62 = vrot.slane %v878_v58, %v2386_v39  ;;  %v893_v63 = vrot.slane %v1902_v59, %v2386_v39  ;;  %v901_v1 = vrot.slane %v894_v60, %v2386_v39  ;;  %v909_v2 = vrot.slane %v1903_v61, %v2386_v39 }
 0x3f5   : > { %v910_v3 = vcombine.low %v885_v62, %v893_v63  ;;  %v926_v4 = vcombine.low %v901_v1, %v909_v2  ;;  %v911_v6 = vcombine.high %v885_v62, %v893_v63  ;;  %v927_v7 = vcombine.high %v901_v1, %v909_v2 }
 0x3f6   : > { %v2133_v8 = vpop.eup %2132 }
 0x3f7   : > { %v1166_v10 = vsel %vm954_vm2, %v2133_v8, 0.0  ;;  %v918_v11 = vrot.slane %v910_v3, %v2396_v49  ;;  %v934_v12 = vrot.slane %v926_v4, %v2396_v49  ;;  %v925_v13 = vrot.slane %v911_v6, %v2396_v49 }
 0x3f8   : > { %1167 = vadd.xlane.f32.xlu0 %v1166_v10  ;;  %v941_v14 = vrot.slane %v927_v7, %v2396_v49  ;;  %v1176_v30 = vpack.c.bf16 %v2133_v8, %v2133_v8 }
 0x3f9   : > { %v942_v15 = vcombine.low %v918_v11, %v934_v12  ;;  %v943_v16 = vcombine.high %v918_v11, %v934_v12 }
 0x3fa   : > { %v944_v17 = vcombine.low %v925_v13, %v941_v14  ;;  %v945_v18 = vcombine.high %v925_v13, %v941_v14 }
 0x3fb   : > { %v1179_v19 = vpack.c.bf16 %v942_v15, %v942_v15  ;;  %v1180_v20 = vpack.c.bf16 %v943_v16, %v943_v16 }
 0x3fc   : > { %v1181_v24 = vpack.c.bf16 %v944_v17, %v944_v17  ;;  %v1182_v25 = vpack.c.bf16 %v945_v18, %v945_v18 }
 0x3fd   : > { %v1188_v21 = vsel %vm1186_vm3, %v1179_v19, 0  ;;  %v1234_v23 = vsel %vm1186_vm3, %v1180_v20, 0 }
 0x3fe   : > { %2004 = vmatpush3.bf16.msra.mxu1 %v1188_v21  ;;  %2010 = vmatpush3.bf16.msra.mxu0 %v1234_v23  ;;  %v1280_v31 = vsel %vm1186_vm3, %v1181_v24, 0  ;;  %v1326_v32 = vsel %vm1186_vm3, %v1182_v25, 0  ;;  %v2116_v21 = vld [vmem:[%s2647_s4 + $0x8] sm:$0xff]  }
 0x3ff   : > { %2015 = vmatprep.subr.bf16.mxu1 %v2212_v5  ;;  %2021 = vmatprep.subr.bf16.mxu0 %v2212_v5 }
 0x401   : > { %2006 = vmatmul.mubr.msk.bf16.vlgmr.msra.gmra.mxu1 %vm954_vm2, %v1175_v29  ;;  %2012 = vmatmul.mubr.msk.bf16.vlgmr.msra.gmra.mxu0 %vm954_vm2, %v1176_v30 }
 0x402   : > { %2016 = vmatpush3.bf16.msra.mxu1 %v1280_v31  ;;  %2022 = vmatpush3.bf16.msra.mxu0 %v1326_v32 }
 0x403   : > { %2023 = vmatprep.mubr.msk.bf16.mxu0 %vm2213_vm1, %v2212_v5  ;;  %2017 = vmatprep.mubr.msk.bf16.mxu1 %vm2213_vm1, %v2212_v5 }
 0x404   : > { %2027 = vmatprep.subr.bf16.mxu1 %v2212_v5  ;;  %2035 = vmatprep.subr.bf16.mxu0 %v2212_v5 }
 0x415   : > { %v1150_v33 = vpop.xlane.xlu1 %1149 }
 0x416   : > { %v1154_v27 = vsub.f32 %v2450_v22, %v1150_v33 }
 0x418   : > { %v1161_v34 = vmul.f32 1.442695, %v1154_v27  ;;  %v2117_v27 = vld [vmem:[%s2647_s4] sm:$0xff]  }
 0x419   : > { %v1147_v35 = vpop.xlane.xlu0 %1146 }
 0x41a   : > { %2134 = vpow2.f32 %v1161_v34  ;;  %v1153_v36 = vsub.f32 %v2446_v9, %v1147_v35 }
 0x41c   : > { %v1159_v28 = vmul.f32 1.442695, %v1153_v36 }
 0x41e   : > { %2136 = vpow2.f32 %v1159_v28 }
 0x427   : > { %v2135_v37 = vpop.eup %2134 }
 0x428   : > { %v1172_v38 = vsel %vm954_vm2, %v2135_v37, 0.0  ;;  %v1178_v26 = vpack.c.bf16 %v2135_v37, %v2135_v37 }
 0x429   : > { %1173 = vadd.xlane.f32.xlu0 %v1172_v38 }
 0x42a   : > { %2024 = vmatmul.mubr.msk.bf16.vlgmr.msra.gmra.mxu0 %vm954_vm2, %v1178_v26 }
 0x42b   : > { %v2137_v40 = vpop.eup %2136  ;;  %2039 = vmatprep.mubr.msk.bf16.mxu0 %vm2213_vm1, %v2212_v5 }
 0x42c   : > { %v1169_v22 = vsel %vm954_vm2, %v2137_v40, 0.0  ;;  %v1177_v41 = vpack.c.bf16 %v2137_v40, %v2137_v40 }
 0x42d   : > { %1170 = vadd.xlane.f32.xlu1 %v1169_v22 }
 0x42e   : > { %2018 = vmatmul.mubr.msk.bf16.vlgmr.msra.gmra.mxu1 %vm954_vm2, %v1177_v41 }
 0x42f   : > { %2031 = vmatprep.mubr.msk.bf16.mxu1 %vm2213_vm1, %v2212_v5  ;;  %2028 = vmatpush3.bf16.msra.mxu1 %v2116_v21  ;;  %v2123_v21 = vld [vmem:[%s2653_s10 + $0x20] sm:$0xff]  }
 0x430   : > { %2029 = vmatprep.subr.bf16.mxu1 %v2212_v5 }
 0x433   : > { %2030 = vmatpush3.bf16.msra.mxu1 %v2117_v27 }
 0x434   : > { %2043 = vmatprep.subr.bf16.mxu1 %v2212_v5 }
 0x47a   : > { %v1165_v50 = vpop.xlane.xlu0 %1164 }
 0x481   : > { %v1168_v51 = vpop.xlane.xlu0 %1167 }
 0x4b2   : > { %v1174_v52 = vpop.xlane.xlu0 %1173 }
 0x4b3   : > { %2138 = vrcp.f32 %v1174_v52 }
 0x4b4   : > { %2140 = vrcp.f32 %v1168_v51 }
 0x4b5   : > { %2142 = vrcp.f32 %v1165_v50 }
 0x4b6   : > { %v1171_v53 = vpop.xlane.xlu1 %1170 }
 0x4b7   : > { %2144 = vrcp.f32 %v1171_v53  ;;  %v1914_v53 = vld [vmem:[%s2648_s5] ss:$0 sm:$0xff] }
 0x4c0   : > { %v2139_v54 = vpop.eup %2138 }
 0x4c1   : > { %v1224_v9 = vpop.f32.mrf.mxu1  ;;  %v1270_v42 = vpop.f32.mrf.mxu0 }
 0x4c2   : > { %v2141_v57 = vpop.eup %2140 }
 0x4c3   : > { %v2007_v43 = vpop.f32.mrf.mxu1  ;;  %v2013_v44 = vpop.f32.mrf.mxu0  ;;  %v1373_v60 = vmul.f32 %v2141_v57, %v1270_v42 }
 0x4c4   : > { %v2143_v59 = vpop.eup %2142 }
 0x4c5   : > { %v1227_v45 = vpop.f32.mrf.mxu1  ;;  %v1273_v46 = vpop.f32.mrf.mxu0  ;;  %v1372_v1 = vmul.f32 %v2143_v59, %v1224_v9 }
 0x4c6   : > { %v2145_v61 = vpop.eup %2144 }
 0x4c7   : > { %v2008_v47 = vpop.f32.mrf.mxu1  ;;  %v2014_v48 = vpop.f32.mrf.mxu0 }
 0x4ea   : > { %v1362_v55 = vpop.f32.mrf.mxu0 }
 0x4eb   : > { %v1375_v56 = vmul.f32 %v2139_v54, %v1362_v55 }
 0x4ec   : > { %v2025_v58 = vpop.f32.mrf.mxu0 }
 0x4ed   : > { %v1392_v2 = vcombine.low %v1373_v60, %v1375_v56  ;;  %v1393_v3 = vcombine.high %v1373_v60, %v1375_v56 }
 0x4ee   : > { %v1316_v62 = vpop.f32.mrf.mxu1  ;;  %v1365_v63 = vpop.f32.mrf.mxu0 }
 0x4ef   : > { %v1374_v4 = vmul.f32 %v2145_v61, %v1316_v62  ;;  %v1400_v12 = vrot.slane %v1392_v2, %v2386_v39  ;;  %v1407_v13 = vrot.slane %v1393_v3, %v2386_v39  ;;  %v2118_v63 = vld [vmem:[%s2651_s8 + $0x8] sm:$0xff]   ;;  %v2121_v2 = vld [vmem:[%s2653_s10 + $0x30] sm:$0xff]  }
 0x4f0   : > { %v2019_v6 = vpop.f32.mrf.mxu1  ;;  %v2026_v7 = vpop.f32.mrf.mxu0  ;;  %2036 = vmatpush3.bf16.msra.mxu0 %v2118_v63 }
 0x4f1   : > { %v1376_v8 = vcombine.low %v1372_v1, %v1374_v4  ;;  %v1377_v10 = vcombine.high %v1372_v1, %v1374_v4  ;;  %2037 = vmatprep.subr.bf16.mxu0 %v2212_v5  ;;  %v2120_v1 = vld [vmem:[%s2653_s10 + $0x38] sm:$0xff]  }
 0x4f2   : > { %v1319_v11 = vpop.f32.mrf.mxu1 }
 0x4f3   : > { %v1384_v14 = vrot.slane %v1376_v8, %v2386_v39  ;;  %v1391_v15 = vrot.slane %v1377_v10, %v2386_v39 }
 0x4f4   : > { %v2020_v16 = vpop.f32.mrf.mxu1 }
 0x4f5   : > { %v1408_v17 = vcombine.low %v1384_v14, %v1400_v12  ;;  %v1409_v18 = vcombine.high %v1384_v14, %v1400_v12  ;;  %v1424_v19 = vcombine.low %v1391_v15, %v1407_v13  ;;  %v1425_v20 = vcombine.high %v1391_v15, %v1407_v13  ;;  %v1918_v14 = vld [vmem:[%s2649_s6] ss:$0 sm:$0xff] }
 0x4f6   : > { %v1919_v16 = vld [vmem:[%s2650_s7] ss:$0 sm:$0xff] }
 0x4f7   : > { %v1416_v23 = vrot.slane %v1408_v17, %v2396_v49  ;;  %v1423_v24 = vrot.slane %v1409_v18, %v2396_v49  ;;  %v1432_v25 = vrot.slane %v1424_v19, %v2396_v49  ;;  %v1439_v29 = vrot.slane %v1425_v20, %v2396_v49  ;;  %v2122_v20 = vld [vmem:[%s2653_s10 + $0x28] sm:$0xff]  }
 0x4f9   : > { %v1444_v30 = vcombine.low %v1416_v23, %v1423_v24  ;;  %v1912_v31 = vcombine.high %v1416_v23, %v1423_v24  ;;  %v1460_v32 = vcombine.low %v1432_v25, %v1439_v29  ;;  %v1913_v33 = vcombine.high %v1432_v25, %v1439_v29  ;;  %v2124_v23 = vld [vmem:[%s2653_s10 + $0x18] sm:$0xff]   ;;  %v2125_v24 = vld [vmem:[%s2653_s10 + $0x10] sm:$0xff]   ;;  %v2126_v25 = vld [vmem:[%s2653_s10 + $0x8] sm:$0xff]  }
 0x4fa   : > { %v2127_v29 = vld [vmem:[%s2653_s10] sm:$0xff]  }
 0x4fb   : > { %v1451_v34 = vrot.slane %v1444_v30, %v2386_v39  ;;  %v1459_v35 = vrot.slane %v1912_v31, %v2386_v39  ;;  %v1467_v36 = vrot.slane %v1460_v32, %v2386_v39  ;;  %v1475_v28 = vrot.slane %v1913_v33, %v2386_v39  ;;  %v1920_v30 = vld [vmem:[%s2652_s9] ss:$0 sm:$0xff] }
 0x4fd   : > { %v1477_v37 = vcombine.high %v1451_v34, %v1459_v35  ;;  %v1493_v38 = vcombine.high %v1467_v36, %v1475_v28  ;;  %v1476_v26 = vcombine.low %v1451_v34, %v1459_v35  ;;  %v1492_v40 = vcombine.low %v1467_v36, %v1475_v28 }
 0x4ff   : > { %v1491_v22 = vrot.slane %v1477_v37, %v2396_v49  ;;  %v1507_v41 = vrot.slane %v1493_v38, %v2396_v49  ;;  %v1484_v9 = vrot.slane %v1476_v26, %v2396_v49  ;;  %v1500_v42 = vrot.slane %v1492_v40, %v2396_v49  ;;  %v1924_v26 = vld [vmem:[%s2654_s11] ss:$0 sm:$0xff] }
 0x501   : > { %v1510_v43 = vcombine.low %v1491_v22, %v1507_v41  ;;  %v1509_v44 = vcombine.high %v1484_v9, %v1500_v42  ;;  %v1508_v45 = vcombine.low %v1484_v9, %v1500_v42  ;;  %v1511_v39 = vcombine.high %v1491_v22, %v1507_v41 }
 0x503   : > { %1517 = vrot.lane.b32.xlu0 %v1510_v43, %s2221_s19  ;;  %1513 = vrot.lane.b32.xlu1 %v1509_v44, %s2222_s20  ;;  %s404_s19 = scalar_lea.vmem [#allocation2], %s1891_s15 }
 0x504   : > { %s1828_s20 = sshll.u32 %s404_s19, 4  ;;  %s2603_s20 = int_to_ptr.vmem [resolvable:$true] %s1828_s20 }
 0x505   : > { %s2150_s15 = scalar_lea.vmem %s2603_s20, 128  ;;  %p2157_p0 = scmp.lt.s32.totalorder %s2603_s20, %s2155_s17 }
 0x506   : > { %p2151_p11 = scmp.ne.s32.totalorder %s2603_s20, %s2150_s15  ;;  %p2158_p1 = scmp.lt.s32.totalorder %s2156_s18, %s2150_s15 }
 0x507   : > { %1521 = vrot.lane.b32.xlu1 %v1511_v39, %s2223_s26 }
 0x508   : > { %p2152_p12 = pnand %p2151_p11, %p2328_p5  ;;  %p2159_p2 = por %p2158_p1, %p2157_p0 }
 0x50a   : > { %p2153_p13 = pneg %p2152_p12 }
 0x50c   : > { %p2160_p3 = pnand %p2159_p2, %p2153_p13 }
 0x575   : > { %v1514_v46 = vpop.permute.xlu1 %1513  ;;  %v1518_v47 = vpop.permute.xlu0 %1517 }
 0x576   : > { %v1524_v48 = vsel %vm954_vm2, %v1508_v45, %v1514_v46 }
 0x577   : > { %v1526_v51 = vsel %vm1525_vm4, %v1524_v48, %v1518_v47 }
 0x579   : > { %v1522_v50 = vpop.permute.xlu1 %1521 }
 0x57a   : > { %v1528_v52 = vsel %vm1527_vm5, %v1526_v51, %v1522_v50 }
 0x57b   : > { %v1529_v49 = vpack.c.bf16 %v1528_v52, %v1528_v52 }
 0x57d   : > { %2032 = vmatmul.mubr.msk.bf16.vlgmr.msra.gmra.mxu1 %vm413_vm0, %v1529_v49 }
 0x57e   : > { %2059 = vmatprep.mubr.msk.bf16.mxu1 %vm2213_vm1, %v2212_v5  ;;  %2044 = vmatpush3.bf16.msra.mxu1 %v2120_v1 }
 0x57f   : > { %2045 = vmatprep.subr.bf16.mxu1 %v2212_v5 }
 0x582   : > { %2046 = vmatpush3.bf16.msra.mxu1 %v2121_v2 }
 0x583   : > { %2047 = vmatprep.subr.bf16.mxu1 %v2212_v5 }
 0x586   : > { %2048 = vmatpush3.bf16.msra.mxu1 %v2122_v20 }
 0x587   : > { %2049 = vmatprep.subr.bf16.mxu1 %v2212_v5 }
 0x58a   : > { %2050 = vmatpush3.bf16.msra.mxu1 %v2123_v21 }
 0x58b   : > { %2051 = vmatprep.subr.bf16.mxu1 %v2212_v5 }
 0x58e   : > { %2052 = vmatpush3.bf16.msra.mxu1 %v2124_v23 }
 0x58f   : > { %2053 = vmatprep.subr.bf16.mxu1 %v2212_v5 }
 0x592   : > { %2054 = vmatpush3.bf16.msra.mxu1 %v2125_v24 }
 0x593   : > { %2055 = vmatprep.subr.bf16.mxu1 %v2212_v5 }
 0x596   : > { %2056 = vmatpush3.bf16.msra.mxu1 %v2126_v25 }
 0x597   : > { %2057 = vmatprep.subr.bf16.mxu1 %v2212_v5 }
 0x59a   : > { %2058 = vmatpush3.bf16.msra.mxu1 %v2127_v29 }
 0x63d   : > { %v1590_v54 = vpop.f32.mrf.mxu1 }
 0x63e   : > { %v1591_v55 = vadd.f32 %v1914_v53, %v1590_v54 }
 0x63f   : > { %v2033_v56 = vpop.f32.mrf.mxu1 }
 0x640   : > { %v2536_v57 = vadd.f32 %v1591_v55, %v2343_v0  ;;  %v2119_v0 = vld [vmem:[%s2651_s8] sm:$0xff]  }
 0x641   : > { %v1593_v58 = vpop.f32.mrf.mxu1  ;;  %2038 = vmatpush3.bf16.msra.mxu0 %v2119_v0 }
 0x642   : > { %v1599_v59 = vsel %vm413_vm0, %v2536_v57, 0.0  ;;  %v1603_v60 = vmul.f32 %v2536_v57, %v2536_v57 }
 0x643   : > { %1600 = vadd.xlane.f32.xlu1 %v1599_v59  ;;  %v2034_v61 = vpop.f32.mrf.mxu1 }
 0x644   : > { %v1604_v62 = vsel %vm413_vm0, %v1603_v60, 0.0 }
 0x645   : > { %1605 = vadd.xlane.f32.xlu0 %v1604_v62 }
 0x6cc   : > { %v1601_v3 = vpop.xlane.xlu1 %1600 }
 0x6cd   : > { %v1602_v4 = vmul.f32 0.03125, %v1601_v3 }
 0x6ce   : > { %v1606_v6 = vpop.xlane.xlu0 %1605 }
 0x6cf   : > { %v1608_v7 = vmul.f32 %v1602_v4, %v1602_v4  ;;  %v1607_v8 = vmul.f32 0.03125, %v1606_v6  ;;  %v1610_v12 = vsub.f32 %v2536_v57, %v1602_v4 }
 0x6d1   : > { %v1609_v10 = vsub.f32 %v1607_v8, %v1608_v7 }
 0x6d3   : > { %v1611_v11 = vadd.f32 1e-05, %v1609_v10 }
 0x6d5   : > { %2146 = vrsqrt.f32 %v1611_v11 }
 0x6e2   : > { %v2147_v13 = vpop.eup %2146 }
 0x6e3   : > { %v1613_v15 = vmul.f32 %v2147_v13, %v1610_v12 }
 0x6e5   : > { %v1620_v17 = vmul.f32 %v1918_v14, %v1613_v15 }
 0x6e7   : > { %v1627_v18 = vadd.f32 %v1919_v16, %v1620_v17 }
 0x6e9   : > { %v1628_v19 = vpack.c.bf16 %v1627_v18, %v1627_v18 }
 0x6eb   : > { %2040 = vmatmul.mubr.msk.bf16.vlgmr.msra.gmra.mxu0 %vm413_vm0, %v1628_v19 }
 0x7ab   : > { %v1689_v31 = vpop.f32.mrf.mxu0 }
 0x7ac   : > { %v1690_v32 = vadd.f32 %v1920_v30, %v1689_v31 }
 0x7ad   : > { %v2041_v33 = vpop.f32.mrf.mxu0 }
 0x7ae   : > { %v1696_v27 = vmul.f32 0.70710677, %v1690_v32  ;;  %v1695_v5 = vmul.f32 0.5, %v1690_v32 }
 0x7af   : > { %v1692_v34 = vpop.f32.mrf.mxu0 }
 0x7b0   : > { %2148 = verf.f32 %v1696_v27 }
 0x7b1   : > { %v2042_v35 = vpop.f32.mrf.mxu0 }
 0x7bd   : > { %v2149_v36 = vpop.eup %2148 }
 0x7be   : > { %v1698_v28 = vadd.f32 1.0, %v2149_v36 }
 0x7c0   : > { %v1699_v37 = vmul.f32 %v1698_v28, %v1695_v5 }
 0x7c2   : > { %v1700_v38 = vpack.c.bf16 %v1699_v37, %v1699_v37 }
 0x7c4   : > { %2060 = vmatmul.mubr.bf16.vlgmr.msra.gmra.mxu1 %v1700_v38 }
 0x884   : > { %v1806_v40 = vpop.f32.mrf.mxu1 }
 0x885   : > { %v1807_v22 = vadd.f32 %v1924_v26, %v1806_v40 }
 0x886   : > { %v2061_v41 = vpop.f32.mrf.mxu1 }
 0x887   : > { %v1812_v9 = vadd.f32 %v1807_v22, %v2536_v57 }
 0x888   : > { %v1809_v42 = vpop.f32.mrf.mxu1 }
 0x889   : > { %1813 = vst.msk [vmem:[%s404_s19] sm:$0xff] %vm413_vm0, %v1812_v9 }
 0x88a   : > { %v2062_v43 = vpop.f32.mrf.mxu1 }
 0x88b   : > { %2163 = shalt.err (!%p2160_p3)
}
 0x88c   : > { %s2164_s19 = scalar_lea.hbm %s2601_s0, 128  ;;  %s2168_s28 = scalar_lea.hbm %s2655_s12, 256 }
 0x88d   : > { %p2165_p4 = scmp.ne.s32.totalorder %s2601_s0, %s2164_s19  ;;  %p2169_p9 = scmp.lt.s32.totalorder %s2601_s0, %s2655_s12 }
 0x88e   : > { %p2170_p10 = scmp.lt.s32.totalorder %s2168_s28, %s2164_s19 }
 0x88f   : > { %p2166_p7 = pnand %p2165_p4, %p2328_p5 }
 0x890   : > { %p2171_p11 = por %p2170_p10, %p2169_p9 }
 0x891   : > { %p2167_p8 = pneg %p2166_p7 }
 0x893   : > { %p2172_p12 = pnand %p2171_p11, %p2167_p8 }
 0x895   : > { %2175 = shalt.err (!%p2172_p12)
}
 0x896   : > { %2063 = dma.vmem_to_hbm [thread:$0]  (%p2328_p5), %s2603_s20, 128, %s2601_s0, %s1815_s25  }
 0x897 PF: > { %p2069_p13 = scmp.ge.s32.totalorder %s2210_s24, 2  ;;  %s1840_s15 = sand.u32 1, %s2198_s21  }
 0x898   : > { %s1841_s1 = scalar_lea.sflag [#allocation3], %s1840_s15 }
 0x899   : > { %p2066_p0 = pnand %p2069_p13, %p2332_p6 }
 0x89b   : > { %p2067_p1 = pneg %p2066_p0 }
 0x89d   : > { %2193 = dma.done.wait (%p2067_p1), %s1841_s1, 128  }
 0x89e   : > { %2195 = vsyncadd (%p2067_p1), %s1841_s1, 4294967168  ;;  %p22_p2 = scmp.ge.s32.totalorder %s2315_s27, 4   ;;  %s2662_s21 = smov %s2202_s22 }
 0x89f   : > { %s2663_s22 = smov %s2206_s23  ;;  %s2664_s23 = smov %s2326_s30 }
 0x8a0   : > { %s2665_s24 = smov %s2315_s27  ;;  %24 = sbr.rel (!%p22_p2) target bundleno = 6 (0x6), region = 103 }
 0x8a5   :  { %1846 = vsyncpa [#allocation3], 1 }
 0x8a6   :  { %1848 = vsyncpa [#allocation3 + $0x1], 1 }

</bundles_post_ra>
